<compile_context>
chip_gen: v7x
topology: tpu7x:2x2x1
jax: 0.10.0
libtpu: 0.0.40
codegen_flags: <defaults>
</compile_context>

<pallas_src>
import jax
import jax.numpy as jnp
import numpy as np
from jax.experimental import pallas as pl
from jax.experimental.pallas import tpu as pltpu  # noqa: F401

LANE = 128      # lane width: x / weights / merged output padded to this
OUT_DIM = 10    # Linear(hidden_dim, 10)
ONE_PRE = 30.0  # tanh(30) == 1.0 exactly in f32 -> "constant 1" column of h_new


def _keyframe_kernel(x_ref, wcat_ref, wout_ref, out_ref):
    # Fused RNN step: one MXU matmul (bf16 inputs, f32 accumulate); biases are
    # baked into wcat via the constant-1.0 lane of the packed x.
    h_new = jnp.tanh(
        jnp.dot(x_ref[...].astype(jnp.bfloat16), wcat_ref[...],
                preferred_element_type=jnp.float32))            # (B, 128) f32
    out_ref[1] = h_new                                          # lane-dense store (padded hidden)

    # MLP head: bout is baked into wout via h_new's tanh-saturated 1.0 column.
    logits = jnp.dot(h_new.astype(jnp.bfloat16), wout_ref[...],
                     preferred_element_type=jnp.float32)        # (B, 128) f32
    out_ref[0] = jax.nn.sigmoid(logits)                         # lane-dense store (padded scores)


def pack_params(params):
    """One-time weight packing (fuse ih/hh, fold both biases, pad to 128, cast bf16).

    Call once after init / weight update — NOT per forward step.

    Layout (all zero-padded to 128x128):
      wcat rows: [0..F+A)      = W_ih
                 [F+A..F+A+H)  = W_hh
                 row F+A+H     = b_ih + b_hh  (hit by the 1.0 lane of packed x)
                                 plus +30.0 in column H -> h_new[:, H] == 1.0
      wout rows: [0..H)        = W_out
                 row H         = b_out        (hit by h_new's 1.0 column)
    """
    input_dim, H = params["wih"].shape
    bias_row = input_dim + H          # lane index of the 1.0 in packed x
    one_col = H                       # first padded hidden column, carries tanh(30)=1.0
    assert bias_row < LANE and one_col < LANE and OUT_DIM <= H

    wcat = jnp.zeros((LANE, LANE), jnp.float32)
    wcat = wcat.at[:input_dim, :H].set(params["wih"])
    wcat = wcat.at[input_dim:input_dim + H, :H].set(params["whh"])
    wcat = wcat.at[bias_row, :H].set(params["bih"][0] + params["bhh"][0])
    wcat = wcat.at[bias_row, one_col].set(ONE_PRE)

    wout = jnp.zeros((LANE, LANE), jnp.float32)
    wout = wout.at[:H, :OUT_DIM].set(params["wout"])
    wout = wout.at[one_col, :OUT_DIM].set(params["bout"][0])

    return {"wcat": wcat.astype(jnp.bfloat16), "wout": wout.astype(jnp.bfloat16)}


@jax.jit
def keyframe_selection_forward(segment_features, previous_action, hidden, packed):
    """segment_features: (B, F), previous_action: (B, A), hidden: (1, B, H)."""
    B = segment_features.shape[0]
    H = hidden.shape[2]
    h0 = hidden[0]                                                    # (B, H)

    # Pre-pack x as a single lane-dense (B, 128) f32 buffer (XLA fuses concat+pad):
    # [features | action | hidden | 1.0 (bias lane) | zeros].
    used = segment_features.shape[1] + previous_action.shape[1] + H + 1
    x = jnp.concatenate(
        [segment_features, previous_action, h0,
         jnp.ones((B, 1), jnp.float32),
         jnp.zeros((B, LANE - used), jnp.float32)], axis=1)           # (B, 128)

    full = lambda shape: pl.BlockSpec(shape, lambda: (0,) * len(shape))

    out = pl.pallas_call(
        _keyframe_kernel,
        out_shape=jax.ShapeDtypeStruct((2, B, LANE), jnp.float32),    # [scores; h_new], merged
        in_specs=[
            full(x.shape),
            full(packed["wcat"].shape),
            full(packed["wout"].shape),
        ],
        out_specs=full((2, B, LANE)),
        cost_estimate=pl.CostEstimate(
            flops=4 * B * LANE * LANE,                 # two (B,128)x(128,128) matmuls
            transcendentals=2 * B * LANE,              # tanh + sigmoid
            bytes_accessed=2 * LANE * LANE * 2         # bf16 weights
                           + B * LANE * 4              # packed x
                           + 2 * B * LANE * 4),        # merged output
    )(x, packed["wcat"], packed["wout"])

    frame_scores = out[0, :, :OUT_DIM]                 # (B, 10)
    new_hidden = out[1:2, :, :H]                       # (1, B, H) — no reshape needed
    return frame_scores, new_hidden


def init_params(input_dim, hidden_dim, key):
    """PyTorch-like uniform(-1/sqrt(H), 1/sqrt(H)) init, weights stored transposed."""
    k = jax.random.split(key, 6)
    bound = 1.0 / jnp.sqrt(hidden_dim)
    u = lambda kk, shape: jax.random.uniform(kk, shape, jnp.float32, -bound, bound)
    return {
        # stored transposed: (in_features, out_features)
        "wih":  u(k[0], (input_dim, hidden_dim)),
        "whh":  u(k[1], (hidden_dim, hidden_dim)),
        "bih":  u(k[2], (1, hidden_dim)),
        "bhh":  u(k[3], (1, hidden_dim)),
        "wout": u(k[4], (hidden_dim, OUT_DIM)),
        "bout": u(k[5], (1, OUT_DIM)),
    }


def _reference_forward(segment_features, previous_action, hidden, params):
    """Pure-JAX f32 reference matching the PyTorch module."""
    x = jnp.concatenate([segment_features, previous_action], axis=1)
    h = hidden[0]
    h_new = jnp.tanh(x @ params["wih"] + params["bih"] + h @ params["whh"] + params["bhh"])
    scores = jax.nn.sigmoid(h_new @ params["wout"] + params["bout"])
    return scores, h_new[jnp.newaxis]


if __name__ == "__main__":
    key = jax.random.PRNGKey(0)
    k_feat, k_act, k_hid, k_par = jax.random.split(key, 4)

    B = 2            # batch
    FEAT = 24        # segment feature dim
    ACT = 8          # previous-action dim
    INPUT_DIM = FEAT + ACT   # 32
    HIDDEN = 32

    segment_features = jax.random.normal(k_feat, (B, FEAT), jnp.float32)
    previous_action = jax.random.normal(k_act, (B, ACT), jnp.float32)
    hidden = jax.random.normal(k_hid, (1, B, HIDDEN), jnp.float32)

    params = init_params(INPUT_DIM, HIDDEN, k_par)
    packed = pack_params(params)          # one-time packing (fused/padded/bf16, biases folded)

    scores, new_hidden = keyframe_selection_forward(
        segment_features, previous_action, hidden, packed)
    jax.block_until_ready((scores, new_hidden))

    assert scores.shape == (B, OUT_DIM)
    assert new_hidden.shape == (1, B, HIDDEN)

    # Numerical sanity check vs. the f32 reference (bf16 weights => loose tolerance).
    ref_scores, ref_hidden = _reference_forward(
        segment_features, previous_action, hidden, params)
    np.testing.assert_allclose(np.asarray(scores), np.asarray(ref_scores), atol=5e-2)
    np.testing.assert_allclose(np.asarray(new_hidden), np.asarray(ref_hidden), atol=5e-2)

    print("KERNEL_OK")
</pallas_src>

<mosaic_0001>
module attributes {stable_mosaic.version = 11 : i64} {
  func.func @_keyframe_kernel(%arg0: memref<2x128xf32, #tpu.memory_space<vmem>>, %arg1: memref<128x128xbf16, #tpu.memory_space<vmem>>, %arg2: memref<128x128xbf16, #tpu.memory_space<vmem>>, %arg3: memref<2x2x128xf32, #tpu.memory_space<vmem>>) attributes {dimension_semantics = [], scalar_prefetch = 0 : i64, scratch_operands = 0 : i64, tpu.core_type = #tpu.core_type<tc>} {
    %c0 = arith.constant 0 : index
    %c0_0 = arith.constant 0 : index
    %0 = vector.load %arg0[%c0, %c0_0] : memref<2x128xf32, #tpu.memory_space<vmem>>, vector<2x128xf32>
    %1 = arith.truncf %0 : vector<2x128xf32> to vector<2x128xbf16>
    %c0_1 = arith.constant 0 : index
    %c0_2 = arith.constant 0 : index
    %2 = vector.load %arg1[%c0_1, %c0_2] : memref<128x128xbf16, #tpu.memory_space<vmem>>, vector<128x128xbf16>
    %cst = arith.constant dense<0.000000e+00> : vector<2x128xf32>
    %3 = tpu.matmul %1, %2, %cst {dimension_numbers = #tpu.dot_dimension_numbers<[1], [0], [0], [1], [0, 0, 1, 1], [], []>} : vector<2x128xbf16>, vector<128x128xbf16>, vector<2x128xf32> -> vector<2x128xf32>
    %4 = math.tanh %3 : vector<2x128xf32>
    %c1 = arith.constant 1 : index
    %c0_3 = arith.constant 0 : index
    %c0_4 = arith.constant 0 : index
    %5 = vector.load %arg3[%c1, %c0_3, %c0_4] : memref<2x2x128xf32, #tpu.memory_space<vmem>>, vector<1x2x128xf32>
    %6 = vector.shape_cast %5 : vector<1x2x128xf32> to vector<2x128xf32>
    %7 = vector.shape_cast %4 : vector<2x128xf32> to vector<1x2x128xf32>
    tpu.vector_store %arg3[%c1, %c0_3, %c0_4], %7 {strides = array<i32>} : memref<2x2x128xf32, #tpu.memory_space<vmem>>, vector<1x2x128xf32>,
    %8 = arith.truncf %4 : vector<2x128xf32> to vector<2x128xbf16>
    %c0_5 = arith.constant 0 : index
    %c0_6 = arith.constant 0 : index
    %9 = vector.load %arg2[%c0_5, %c0_6] : memref<128x128xbf16, #tpu.memory_space<vmem>>, vector<128x128xbf16>
    %cst_7 = arith.constant dense<0.000000e+00> : vector<2x128xf32>
    %10 = tpu.matmul %8, %9, %cst_7 {dimension_numbers = #tpu.dot_dimension_numbers<[1], [0], [0], [1], [0, 0, 1, 1], [], []>} : vector<2x128xbf16>, vector<128x128xbf16>, vector<2x128xf32> -> vector<2x128xf32>
    %11 = arith.negf %10 : vector<2x128xf32>
    %12 = math.exp %11 : vector<2x128xf32>
    %cst_8 = arith.constant 1.000000e+00 : f32
    %13 = vector.broadcast %cst_8 : f32 to vector<2x128xf32>
    %14 = arith.addf %13, %12 : vector<2x128xf32>
    %15 = arith.divf %13, %14 : vector<2x128xf32>
    %c0_9 = arith.constant 0 : index
    %c0_10 = arith.constant 0 : index
    %c0_11 = arith.constant 0 : index
    %16 = vector.load %arg3[%c0_9, %c0_10, %c0_11] : memref<2x2x128xf32, #tpu.memory_space<vmem>>, vector<1x2x128xf32>
    %17 = vector.shape_cast %16 : vector<1x2x128xf32> to vector<2x128xf32>
    %18 = vector.shape_cast %15 : vector<2x128xf32> to vector<1x2x128xf32>
    tpu.vector_store %arg3[%c0_9, %c0_10, %c0_11], %18 {strides = array<i32>} : memref<2x2x128xf32, #tpu.memory_space<vmem>>, vector<1x2x128xf32>,
    return
  }
}

</mosaic_0001>

<bundles_post_ra>
// kernel: keyframe_selection_forward.1
= control target key start
LH: loop header
LB: loop body
LE: loop exit
PB: predicated region body
PF: predicated region fallthrough
CT: control target
= control target key end

     0   :  { %8 = vsyncpa [#allocation3], 0  ;;  %s481_s0 = inlined_call_operand.vmem [shape: f32[2,128], index: 0, kind: input, shape index: {}]   ;;  %s482_s1 = inlined_call_operand.hbm [shape: bf16[128,128], index: 1, kind: input, shape index: {}]   ;;  %s483_s2 = inlined_call_operand.hbm [shape: bf16[128,128], index: 2, kind: input, shape index: {}]   ;;  %s484_s3 = inlined_call_operand.vmem [shape: f32[2,2,128], index: 3, kind: output, shape index: {}]  }
   0x1   :  { %9 = vsyncpa [#allocation5], 0  ;;  %s422_s12 = smov [#allocation2]   ;;  %s374_s16 = scalar_lea.hbm %s482_s1, 1024 }
   0x2   :  { %s17_s13 = sshll.u32 %s422_s12, 4  ;;  %p375_p0 = scmp.ne.s32.totalorder %s482_s1, %s374_s16  ;;  %s18_s13 = int_to_ptr.vmem [resolvable:$true] %s17_s13 }
   0x3   :  { %p378_p1 = scmp.lt.u32.totalorder %s374_s16, %s482_s1 }
   0x5   :  { %p380_p2 = pnand %p378_p1, %p375_p0 }
   0x7   :  { %383 = shalt.err (!%p380_p2)
}
   0x8   :  { %s384_s21 = scalar_lea.vmem %s18_s13, 1024  ;;  %p389_p4 = scmp.lt.s32.totalorder %s18_s13, %s18_s13 }
   0x9   :  { %p385_p3 = scmp.ne.s32.totalorder %s18_s13, %s384_s21  ;;  %p390_p5 = scmp.lt.s32.totalorder %s384_s21, %s384_s21 }
   0xb   :  { %p391_p6 = por %p390_p5, %p389_p4 }
   0xd   :  { %p392_p7 = pnand %p391_p6, %p385_p3 }
   0xf   :  { %395 = shalt.err (!%p392_p7)
}
  0x10   :  { %s423_s22 = smov 64   ;;  %s424_s23 = smov 4  }
  0x11   :  { %23 = dma.hbm_to_vmem [thread:$0]  %s482_s1, 1024, %s18_s13, [#allocation3], %s423_s22, %s423_s22, %s424_s23  }
  0x12   :  { %s425_s26 = smov [#allocation4]   ;;  %s396_s30 = scalar_lea.hbm %s483_s2, 1024 }
  0x13   :  { %s29_s27 = sshll.u32 %s425_s26, 4  ;;  %p397_p8 = scmp.ne.s32.totalorder %s483_s2, %s396_s30  ;;  %s30_s27 = int_to_ptr.vmem [resolvable:$true] %s29_s27 }
  0x14   :  { %p400_p9 = scmp.lt.u32.totalorder %s396_s30, %s483_s2 }
  0x16   :  { %p402_p10 = pnand %p400_p9, %p397_p8 }
  0x18   :  { %405 = shalt.err (!%p402_p10)
}
  0x19   :  { %s406_s8 = scalar_lea.vmem %s30_s27, 1024  ;;  %p411_p12 = scmp.lt.s32.totalorder %s30_s27, %s30_s27 }
  0x1a   :  { %p407_p11 = scmp.ne.s32.totalorder %s30_s27, %s406_s8  ;;  %p412_p13 = scmp.lt.s32.totalorder %s406_s8, %s406_s8 }
  0x1c   :  { %p413_p0 = por %p412_p13, %p411_p12 }
  0x1e   :  { %p414_p1 = pnand %p413_p0, %p407_p11 }
  0x20   :  { %417 = shalt.err (!%p414_p1)
}
  0x21   :  { %35 = dma.hbm_to_vmem [thread:$0]  %s483_s2, 1024, %s30_s27, [#allocation5], %s423_s22, %s423_s22, %s424_s23  }
  0x22   :  { %418 = dma.done.wait [#allocation3], 1024  }
  0x23   :  { %419 = vsyncadd [#allocation3], 4294966272 }
  0x24   :  { %420 = dma.done.wait [#allocation5], 1024  }
  0x25   :  { %421 = vsyncadd [#allocation5], 4294966272  ;;  %v426_v0 = vmov 0.0   ;;  %vm427_vm0 = vmmov 0   ;;  %v352_v1 = vld [vmem:[#allocation2] sm:$0xff]   ;;  %v353_v2 = vld [vmem:[#allocation2 + $0x8] sm:$0xff]  }
  0x26   :  { %306 = vmatprep.subr.bf16.mxu0 %v426_v0  ;;  %322 = vmatprep.mubr.msk.bf16.mxu0 %vm427_vm0, %v426_v0  ;;  %v354_v3 = vld [vmem:[#allocation2 + $0x10] sm:$0xff]   ;;  %v360_v4 = vld [vmem:[#allocation4] sm:$0xff]   ;;  %v355_v5 = vld [vmem:[#allocation2 + $0x18] sm:$0xff]  }
  0x27   :  { %326 = vmatprep.subr.bf16.mxu1 %v426_v0  ;;  %342 = vmatprep.mubr.msk.bf16.mxu1 %vm427_vm0, %v426_v0  ;;  %v361_v6 = vld [vmem:[#allocation4 + $0x8] sm:$0xff]   ;;  %v356_v7 = vld [vmem:[#allocation2 + $0x20] sm:$0xff]   ;;  %v362_v8 = vld [vmem:[#allocation4 + $0x10] sm:$0xff]  }
  0x28   :  { %307 = vmatpush3.bf16.msra.mxu0 %v352_v1  ;;  %327 = vmatpush3.bf16.msra.mxu1 %v360_v4  ;;  %v357_v9 = vld [vmem:[#allocation2 + $0x28] sm:$0xff]   ;;  %v363_v10 = vld [vmem:[#allocation4 + $0x18] sm:$0xff]   ;;  %v358_v11 = vld [vmem:[#allocation2 + $0x30] sm:$0xff]  }
  0x29   :  { %308 = vmatprep.subr.bf16.mxu0 %v426_v0  ;;  %328 = vmatprep.subr.bf16.mxu1 %v426_v0  ;;  %v364_v12 = vld [vmem:[#allocation4 + $0x20] sm:$0xff]   ;;  %v359_v13 = vld [vmem:[#allocation2 + $0x38] sm:$0xff]   ;;  %v365_v16 = vld [vmem:[#allocation4 + $0x28] sm:$0xff]  }
  0x2a   :  { %v43_v14 = vld [vmem:[%s481_s0] sm:$0x3]  ;;  %v366_v17 = vld [vmem:[#allocation4 + $0x30] sm:$0xff]   ;;  %v367_v18 = vld [vmem:[#allocation4 + $0x38] sm:$0xff]  }
  0x2b   :  { %v44_v15 = vpack.c.bf16 %v43_v14, %v43_v14 }
  0x2c   :  { %309 = vmatpush3.bf16.msra.mxu0 %v353_v2  ;;  %329 = vmatpush3.bf16.msra.mxu1 %v361_v6 }
  0x2d   :  { %310 = vmatprep.subr.bf16.mxu0 %v426_v0  ;;  %330 = vmatprep.subr.bf16.mxu1 %v426_v0 }
  0x30   :  { %311 = vmatpush3.bf16.msra.mxu0 %v354_v3  ;;  %331 = vmatpush3.bf16.msra.mxu1 %v362_v8 }
  0x31   :  { %312 = vmatprep.subr.bf16.mxu0 %v426_v0  ;;  %332 = vmatprep.subr.bf16.mxu1 %v426_v0 }
  0x34   :  { %313 = vmatpush3.bf16.msra.mxu0 %v355_v5  ;;  %333 = vmatpush3.bf16.msra.mxu1 %v363_v10 }
  0x35   :  { %314 = vmatprep.subr.bf16.mxu0 %v426_v0  ;;  %334 = vmatprep.subr.bf16.mxu1 %v426_v0 }
  0x38   :  { %315 = vmatpush3.bf16.msra.mxu0 %v356_v7  ;;  %335 = vmatpush3.bf16.msra.mxu1 %v364_v12 }
  0x39   :  { %316 = vmatprep.subr.bf16.mxu0 %v426_v0  ;;  %336 = vmatprep.subr.bf16.mxu1 %v426_v0 }
  0x3c   :  { %317 = vmatpush3.bf16.msra.mxu0 %v357_v9  ;;  %337 = vmatpush3.bf16.msra.mxu1 %v365_v16 }
  0x3d   :  { %318 = vmatprep.subr.bf16.mxu0 %v426_v0  ;;  %338 = vmatprep.subr.bf16.mxu1 %v426_v0 }
  0x40   :  { %319 = vmatpush3.bf16.msra.mxu0 %v358_v11  ;;  %339 = vmatpush3.bf16.msra.mxu1 %v366_v17 }
  0x41   :  { %320 = vmatprep.subr.bf16.mxu0 %v426_v0  ;;  %340 = vmatprep.subr.bf16.mxu1 %v426_v0 }
  0x44   :  { %321 = vmatpush3.bf16.msra.mxu0 %v359_v13  ;;  %341 = vmatpush3.bf16.msra.mxu1 %v367_v18 }
  0x47   :  { %323 = vmatmul.mubr.bf16.vlgmr.msra.gmra.mrb[0].mxu0 %v44_v15 }
 0x11a   :  { %v143_v19 = vpop.f32.mrb[0].mxu0 }
 0x11b   :  { %368 = vtanh.f32 %v143_v19  ;;  %v324_v20 = vpop.f32.mrb[1].mxu0 }
 0x11c   :  { %v146_v21 = vpop.f32.mrb[2].mxu0 }
 0x11d   :  { %v325_v22 = vpop.f32.mrb[3].mxu0 }
 0x125   :  { %v369_v23 = vpop.eup %368 }
 0x126   :  { %278 = vst [vmem:[%s484_s3 + $0x2] sm:$0x3] %v369_v23  ;;  %v152_v24 = vpack.c.bf16 %v369_v23, %v369_v23 }
 0x128   :  { %343 = vmatmul.mubr.bf16.vlgmr.msra.gmra.mrb[0].mxu1 %v152_v24 }
 0x1fb   :  { %v251_v25 = vpop.f32.mrb[0].mxu1 }
 0x1fc   :  { %v287_v26 = vmul.f32 -1.442695, %v251_v25  ;;  %v344_v27 = vpop.f32.mrb[1].mxu1 }
 0x1fd   :  { %v254_v28 = vpop.f32.mrb[2].mxu1 }
 0x1fe   :  { %370 = vpow2.f32 %v287_v26  ;;  %v345_v29 = vpop.f32.mrb[3].mxu1 }
 0x208   :  { %v371_v30 = vpop.eup %370 }
 0x209   :  { %v260_v31 = vadd.f32 1.0, %v371_v30 }
 0x20b   :  { %372 = vrcp.f32 %v260_v31 }
 0x215   :  { %v373_v32 = vpop.eup %372 }
 0x216   :  { %263 = vst [vmem:[%s484_s3] sm:$0x3] %v373_v32 }
 0x217   :  { %268 = vsyncpa [#allocation3], 1 }
 0x218   :  { %269 = vsyncpa [#allocation5], 1 }

</bundles_post_ra>
